<compile_context>
chip_gen: v6e
topology: v6e:2x2x1
jax: 0.10.0
libtpu: 0.0.40
codegen_flags: <defaults>
</compile_context>

<pallas_src>
from functools import partial

import numpy as np
import jax
import jax.numpy as jnp
from jax import lax
from jax.experimental import pallas as pl
from jax.experimental.pallas import tpu as pltpu


# ---------------------------------------------------------------------------
# Fused kernel
# ---------------------------------------------------------------------------
def _fused_kernel(num_classes, feat_lens, *refs):
    """refs = (x_0..x_{S-1}            (B, C_s*H_s*W_s) f32 flattened features,
               w_ref                   (D, F_total) bf16 GAP-folded packed weight,
               b_ref                   (S, D) f32 per-scale Linear biases,
               lcol_ref, lrow_ref      (B, 1) / (1, B) int32 labels,
               fw_ref, fb_ref          (S,) / (1,) f32 SMEM head params,
               out_ref                 (B, 1) f32,
               emb_ref                 (S, B, D) f32 VMEM scratch)."""
    num_scales = len(feat_lens)
    x_refs = refs[:num_scales]
    (w_ref, b_ref, lcol_ref, lrow_ref, fw_ref, fb_ref,
     out_ref, emb_ref) = refs[num_scales:]

    B = out_ref.shape[0]
    b_all = b_ref[...]                                            # (S, D)

    # --- AvgPool2d + Linear + ReLU per scale -----------------------------
    # GAP is folded into the packed weight (each (C, D) column repeated HW
    # times, scaled 1/HW), so pool+linear is one bf16 MXU dot per scale.
    # Weight slices start at multiples of 128 lanes (L_s in {1024,512,256,128}).
    off = 0
    for s, length in enumerate(feat_lens):
        xs = x_refs[s][...].astype(jnp.bfloat16)                  # (B, L_s)
        ws = w_ref[:, off:off + length]                           # (D, L_s)
        e = lax.dot_general(xs, ws, (((1,), (1,)), ((), ())),
                            preferred_element_type=jnp.float32)   # (B, D)
        e = jnp.maximum(e + b_all[s:s + 1, :], 0.0)               # bias + ReLU
        emb_ref[s] = e                                            # (S, B, D)
        off += length

    # --- GTG-style label propagation, batched over scales ----------------
    # Affinity W = relu(cosine(e_i, e_j)), diagonal zeroed.  One replicator
    # step latent = onehot ⊙ (W @ onehot); its mean over the num_classes axis
    # folds analytically to (1/K) * sum_j W_ij * [label_i == label_j], i.e. a
    # VPU masked row-sum (no N=4 MXU matmul, no one-hot materialization).
    emb = emb_ref[...]                                            # (S, B, D)
    inv_norm = lax.rsqrt(jnp.sum(emb * emb, axis=-1, keepdims=True) + 1e-12)
    en = emb * inv_norm
    aff = jnp.einsum("sbd,skd->sbk", en, en,
                     preferred_element_type=jnp.float32)          # (S, B, B)
    aff = jnp.maximum(aff, 0.0)

    same = lcol_ref[...] == lrow_ref[...]                         # (B, B) bool
    ii = lax.broadcasted_iota(jnp.int32, (B, B), 0)
    jj = lax.broadcasted_iota(jnp.int32, (B, B), 1)
    keep = jnp.where(jnp.logical_and(same, ii != jj), 1.0, 0.0)   # (B, B) f32

    branch = jnp.sum(aff * keep[None, :, :], axis=-1, keepdims=True)  # (S,B,1)

    # --- mean over classes + final Linear(4, 1) head ---------------------
    inv_k = 1.0 / num_classes
    out = jnp.zeros((B, 1), jnp.float32) + fb_ref[0]
    for s in range(num_scales):                                   # tiny, unrolled
        out = out + branch[s] * (fw_ref[s] * inv_k)
    out_ref[...] = out


# ---------------------------------------------------------------------------
# One-time parameter packing (hoisted out of the per-call forward path)
# ---------------------------------------------------------------------------
def pack_gtg_params(params, feature_shapes):
    """feature_shapes: list of (C, H, W) per scale.  Call once, reuse forever."""
    interm_dim = params["interm_dim"]
    blocks = []
    for w, (c, h, wd) in zip(params["ls_weights"], feature_shapes):
        hw = h * wd
        # Fold AvgPool2d(full spatial) into Linear: repeat each input column HW
        # times and scale by 1/HW.  Stored (D, C*HW) -> lane-dense when packed.
        blocks.append(jnp.repeat(w.astype(jnp.float32).T, hw, axis=1) / hw)
    w_packed = jnp.concatenate(blocks, axis=1).astype(jnp.bfloat16)   # (D, F_total)
    b_all = jnp.stack([b.astype(jnp.float32) for b in params["ls_biases"]])  # (S, D)
    fw = params["final_w"].reshape(-1).astype(jnp.float32)            # (S,)
    fb = params["final_b"].reshape(-1).astype(jnp.float32)            # (1,)
    feat_lens = tuple(c * h * wd for (c, h, wd) in feature_shapes)
    return dict(w_packed=jax.block_until_ready(w_packed),
                b_all=jax.block_until_ready(b_all),
                fw=jax.block_until_ready(fw), fb=jax.block_until_ready(fb),
                feat_lens=feat_lens, interm_dim=interm_dim)


# ---------------------------------------------------------------------------
# Forward pass (mirrors Module_LSs_GTG_MLP_alternative.forward)
# ---------------------------------------------------------------------------
def gtg_mlp_alternative_forward(packed, features, weight, labels, num_classes):
    """features: list of NCHW f32 arrays; labels: int (B,); returns (B, 1) f32."""
    del weight  # weight==0 only .detach()es (grad-only); forward values identical
    B = features[0].shape[0]
    feat_lens = packed["feat_lens"]
    S = len(feat_lens)
    D = packed["interm_dim"]

    x_flat = [f.reshape(B, -1) for f in features]          # free, contiguous reshapes
    labels_col = labels.astype(jnp.int32).reshape(B, 1)
    labels_row = labels.astype(jnp.int32).reshape(1, B)

    vmem = pl.BlockSpec(memory_space=pltpu.MemorySpace.VMEM)
    smem = pl.BlockSpec(memory_space=pltpu.MemorySpace.SMEM)

    f_total = sum(feat_lens)
    flops = 2 * B * f_total * D + 2 * S * B * B * D
    bytes_accessed = (4 * B * f_total + 2 * D * f_total + 4 * S * D
                      + 8 * B + 4 * B)

    return pl.pallas_call(
        partial(_fused_kernel, num_classes, feat_lens),
        out_shape=jax.ShapeDtypeStruct((B, 1), jnp.float32),
        in_specs=[vmem] * S + [vmem, vmem, vmem, vmem, smem, smem],
        out_specs=vmem,
        scratch_shapes=[pltpu.VMEM((S, B, D), jnp.float32)],
        compiler_params=pltpu.CompilerParams(vmem_limit_bytes=32 * 1024 * 1024),
        cost_estimate=pl.CostEstimate(flops=flops, transcendentals=S * B,
                                      bytes_accessed=bytes_accessed),
    )(*x_flat, packed["w_packed"], packed["b_all"],
      labels_col, labels_row, packed["fw"], packed["fb"])


# ---------------------------------------------------------------------------
# Pure-JAX reference of the same forward (module semantics + GTG surrogate)
# ---------------------------------------------------------------------------
def _reference_forward(params, features, labels, num_classes):
    B = features[0].shape[0]
    outs = []
    for f, w, b in zip(features, params["ls_weights"], params["ls_biases"]):
        pooled = jnp.mean(f, axis=(2, 3))                               # AvgPool2d
        e = jnp.maximum(pooled @ w + b, 0.0)                            # Linear+ReLU
        en = e * lax.rsqrt(jnp.sum(e * e, axis=-1, keepdims=True) + 1e-12)
        aff = jnp.maximum(en @ en.T, 0.0)                               # GTG affinity
        keep = ((labels[:, None] == labels[None, :])
                & ~jnp.eye(B, dtype=bool)).astype(jnp.float32)
        branch = jnp.sum(aff * keep, axis=-1) / num_classes             # mean over K
        outs.append(branch[:, None])
    return jnp.concatenate(outs, axis=1) @ params["final_w"] + params["final_b"]


# ---------------------------------------------------------------------------
# Deterministic parameter / input construction and smoke test
# ---------------------------------------------------------------------------
if __name__ == "__main__":
    key = jax.random.PRNGKey(0)

    feature_sizes = [16, 8, 4, 2]          # e_d (spatial extent == AvgPool2d kernel)
    num_channels = [4, 8, 16, 32]          # n_c
    interm_dim = 32
    B = 4
    num_classes = 4

    keys = jax.random.split(key, 3 * len(num_channels) + 2)
    k_iter = iter(keys)

    ls_weights, ls_biases, features = [], [], []
    for n_c, e_d in zip(num_channels, feature_sizes):
        ls_weights.append(
            0.1 * jax.random.normal(next(k_iter), (n_c, interm_dim), jnp.float32))
        ls_biases.append(
            0.1 * jax.random.normal(next(k_iter), (interm_dim,), jnp.float32))
        features.append(
            jax.random.normal(next(k_iter), (B, n_c, e_d, e_d), jnp.float32))

    final_w = 0.1 * jax.random.normal(next(k_iter), (4, 1), jnp.float32)
    final_b = 0.1 * jax.random.normal(next(k_iter), (1,), jnp.float32)

    params = {
        "interm_dim": interm_dim,
        "ls_weights": ls_weights,
        "ls_biases": ls_biases,
        "final_w": final_w,
        "final_b": final_b,
    }
    feature_shapes = [(n_c, e_d, e_d)
                      for n_c, e_d in zip(num_channels, feature_sizes)]

    # One-time packing (cache this across calls in real use).
    packed = pack_gtg_params(params, feature_shapes)

    labels = jnp.array([0, 2, 0, 2], dtype=jnp.int32)   # (B,)
    weight = 1                                          # weight==0 only detaches grads

    out = gtg_mlp_alternative_forward(packed, features, weight, labels,
                                      num_classes)
    out = jax.block_until_ready(out)
    assert out.shape == (B, 1) and out.dtype == jnp.float32

    ref = _reference_forward(params, features, labels, num_classes)
    np.testing.assert_allclose(np.asarray(out), np.asarray(ref),
                               rtol=5e-2, atol=5e-3)    # bf16 matmul tolerance
    print("KERNEL_OK")
</pallas_src>

<mosaic_0001>
module attributes {stable_mosaic.version = 11 : i64} {
  func.func @_fused_kernel(%arg0: memref<4x1024xf32, #tpu.memory_space<vmem>>, %arg1: memref<4x512xf32, #tpu.memory_space<vmem>>, %arg2: memref<4x256xf32, #tpu.memory_space<vmem>>, %arg3: memref<4x128xf32, #tpu.memory_space<vmem>>, %arg4: memref<32x1920xbf16, #tpu.memory_space<vmem>>, %arg5: memref<4x32xf32, #tpu.memory_space<vmem>>, %arg6: memref<4x1xi32, #tpu.memory_space<vmem>>, %arg7: memref<1x4xi32, #tpu.memory_space<vmem>>, %arg8: memref<4xf32, #tpu.memory_space<smem>>, %arg9: memref<1xf32, #tpu.memory_space<smem>>, %arg10: memref<4x1xf32, #tpu.memory_space<vmem>>, %arg11: memref<4x4x32xf32, #tpu.memory_space<vmem>>) attributes {dimension_semantics = [], scalar_prefetch = 0 : i64, scratch_operands = 1 : i64, tpu.core_type = #tpu.core_type<tc>} {
    %c0 = arith.constant 0 : index
    %c0_0 = arith.constant 0 : index
    %0 = vector.load %arg5[%c0, %c0_0] : memref<4x32xf32, #tpu.memory_space<vmem>>, vector<4x32xf32>
    %c0_1 = arith.constant 0 : index
    %c0_2 = arith.constant 0 : index
    %1 = vector.load %arg0[%c0_1, %c0_2] : memref<4x1024xf32, #tpu.memory_space<vmem>>, vector<4x1024xf32>
    %2 = arith.truncf %1 : vector<4x1024xf32> to vector<4x1024xbf16>
    %c0_3 = arith.constant 0 : index
    %c0_4 = arith.constant 0 : index
    %3 = vector.load %arg4[%c0_3, %c0_4] : memref<32x1920xbf16, #tpu.memory_space<vmem>>, vector<32x1024xbf16>
    %cst = arith.constant dense<0.000000e+00> : vector<4x32xf32>
    %4 = tpu.matmul %2, %3, %cst {dimension_numbers = #tpu.dot_dimension_numbers<[1], [1], [0], [0], [0, 0, 1, 0], [], []>} : vector<4x1024xbf16>, vector<32x1024xbf16>, vector<4x32xf32> -> vector<4x32xf32>
    %5 = vector.extract_strided_slice %0 {offsets = [0, 0], sizes = [1, 32], strides = [1, 1]} : vector<4x32xf32> to vector<1x32xf32>
    %6 = vector.broadcast %5 : vector<1x32xf32> to vector<4x32xf32>
    %7 = arith.addf %4, %6 : vector<4x32xf32>
    %cst_5 = arith.constant 0.000000e+00 : f32
    %8 = vector.broadcast %cst_5 : f32 to vector<4x32xf32>
    %9 = arith.maximumf %7, %8 : vector<4x32xf32>
    %c0_6 = arith.constant 0 : index
    %c0_7 = arith.constant 0 : index
    %c0_8 = arith.constant 0 : index
    %10 = vector.load %arg11[%c0_6, %c0_7, %c0_8] : memref<4x4x32xf32, #tpu.memory_space<vmem>>, vector<1x4x32xf32>
    %11 = vector.shape_cast %10 : vector<1x4x32xf32> to vector<4x32xf32>
    %12 = vector.shape_cast %9 : vector<4x32xf32> to vector<1x4x32xf32>
    tpu.vector_store %arg11[%c0_6, %c0_7, %c0_8], %12 {strides = array<i32>} : memref<4x4x32xf32, #tpu.memory_space<vmem>>, vector<1x4x32xf32>,
    %c0_9 = arith.constant 0 : index
    %c0_10 = arith.constant 0 : index
    %13 = vector.load %arg1[%c0_9, %c0_10] : memref<4x512xf32, #tpu.memory_space<vmem>>, vector<4x512xf32>
    %14 = arith.truncf %13 : vector<4x512xf32> to vector<4x512xbf16>
    %c0_11 = arith.constant 0 : index
    %c1024 = arith.constant 1024 : index
    %15 = vector.load %arg4[%c0_11, %c1024] : memref<32x1920xbf16, #tpu.memory_space<vmem>>, vector<32x512xbf16>
    %cst_12 = arith.constant dense<0.000000e+00> : vector<4x32xf32>
    %16 = tpu.matmul %14, %15, %cst_12 {dimension_numbers = #tpu.dot_dimension_numbers<[1], [1], [0], [0], [0, 0, 1, 0], [], []>} : vector<4x512xbf16>, vector<32x512xbf16>, vector<4x32xf32> -> vector<4x32xf32>
    %17 = vector.extract_strided_slice %0 {offsets = [1, 0], sizes = [1, 32], strides = [1, 1]} : vector<4x32xf32> to vector<1x32xf32>
    %18 = vector.broadcast %17 : vector<1x32xf32> to vector<4x32xf32>
    %19 = arith.addf %16, %18 : vector<4x32xf32>
    %cst_13 = arith.constant 0.000000e+00 : f32
    %20 = vector.broadcast %cst_13 : f32 to vector<4x32xf32>
    %21 = arith.maximumf %19, %20 : vector<4x32xf32>
    %c1 = arith.constant 1 : index
    %c0_14 = arith.constant 0 : index
    %c0_15 = arith.constant 0 : index
    %22 = vector.load %arg11[%c1, %c0_14, %c0_15] : memref<4x4x32xf32, #tpu.memory_space<vmem>>, vector<1x4x32xf32>
    %23 = vector.shape_cast %22 : vector<1x4x32xf32> to vector<4x32xf32>
    %24 = vector.shape_cast %21 : vector<4x32xf32> to vector<1x4x32xf32>
    tpu.vector_store %arg11[%c1, %c0_14, %c0_15], %24 {strides = array<i32>} : memref<4x4x32xf32, #tpu.memory_space<vmem>>, vector<1x4x32xf32>,
    %c0_16 = arith.constant 0 : index
    %c0_17 = arith.constant 0 : index
    %25 = vector.load %arg2[%c0_16, %c0_17] : memref<4x256xf32, #tpu.memory_space<vmem>>, vector<4x256xf32>
    %26 = arith.truncf %25 : vector<4x256xf32> to vector<4x256xbf16>
    %c0_18 = arith.constant 0 : index
    %c1536 = arith.constant 1536 : index
    %27 = vector.load %arg4[%c0_18, %c1536] : memref<32x1920xbf16, #tpu.memory_space<vmem>>, vector<32x256xbf16>
    %cst_19 = arith.constant dense<0.000000e+00> : vector<4x32xf32>
    %28 = tpu.matmul %26, %27, %cst_19 {dimension_numbers = #tpu.dot_dimension_numbers<[1], [1], [0], [0], [0, 0, 1, 0], [], []>} : vector<4x256xbf16>, vector<32x256xbf16>, vector<4x32xf32> -> vector<4x32xf32>
    %29 = vector.extract_strided_slice %0 {offsets = [2, 0], sizes = [1, 32], strides = [1, 1]} : vector<4x32xf32> to vector<1x32xf32>
    %30 = vector.broadcast %29 : vector<1x32xf32> to vector<4x32xf32>
    %31 = arith.addf %28, %30 : vector<4x32xf32>
    %cst_20 = arith.constant 0.000000e+00 : f32
    %32 = vector.broadcast %cst_20 : f32 to vector<4x32xf32>
    %33 = arith.maximumf %31, %32 : vector<4x32xf32>
    %c2 = arith.constant 2 : index
    %c0_21 = arith.constant 0 : index
    %c0_22 = arith.constant 0 : index
    %34 = vector.load %arg11[%c2, %c0_21, %c0_22] : memref<4x4x32xf32, #tpu.memory_space<vmem>>, vector<1x4x32xf32>
    %35 = vector.shape_cast %34 : vector<1x4x32xf32> to vector<4x32xf32>
    %36 = vector.shape_cast %33 : vector<4x32xf32> to vector<1x4x32xf32>
    tpu.vector_store %arg11[%c2, %c0_21, %c0_22], %36 {strides = array<i32>} : memref<4x4x32xf32, #tpu.memory_space<vmem>>, vector<1x4x32xf32>,
    %c0_23 = arith.constant 0 : index
    %c0_24 = arith.constant 0 : index
    %37 = vector.load %arg3[%c0_23, %c0_24] : memref<4x128xf32, #tpu.memory_space<vmem>>, vector<4x128xf32>
    %38 = arith.truncf %37 : vector<4x128xf32> to vector<4x128xbf16>
    %c0_25 = arith.constant 0 : index
    %c1792 = arith.constant 1792 : index
    %39 = vector.load %arg4[%c0_25, %c1792] : memref<32x1920xbf16, #tpu.memory_space<vmem>>, vector<32x128xbf16>
    %cst_26 = arith.constant dense<0.000000e+00> : vector<4x32xf32>
    %40 = tpu.matmul %38, %39, %cst_26 {dimension_numbers = #tpu.dot_dimension_numbers<[1], [1], [0], [0], [0, 0, 1, 0], [], []>} : vector<4x128xbf16>, vector<32x128xbf16>, vector<4x32xf32> -> vector<4x32xf32>
    %41 = vector.extract_strided_slice %0 {offsets = [3, 0], sizes = [1, 32], strides = [1, 1]} : vector<4x32xf32> to vector<1x32xf32>
    %42 = vector.broadcast %41 : vector<1x32xf32> to vector<4x32xf32>
    %43 = arith.addf %40, %42 : vector<4x32xf32>
    %cst_27 = arith.constant 0.000000e+00 : f32
    %44 = vector.broadcast %cst_27 : f32 to vector<4x32xf32>
    %45 = arith.maximumf %43, %44 : vector<4x32xf32>
    %c3 = arith.constant 3 : index
    %c0_28 = arith.constant 0 : index
    %c0_29 = arith.constant 0 : index
    %46 = vector.load %arg11[%c3, %c0_28, %c0_29] : memref<4x4x32xf32, #tpu.memory_space<vmem>>, vector<1x4x32xf32>
    %47 = vector.shape_cast %46 : vector<1x4x32xf32> to vector<4x32xf32>
    %48 = vector.shape_cast %45 : vector<4x32xf32> to vector<1x4x32xf32>
    tpu.vector_store %arg11[%c3, %c0_28, %c0_29], %48 {strides = array<i32>} : memref<4x4x32xf32, #tpu.memory_space<vmem>>, vector<1x4x32xf32>,
    %c0_30 = arith.constant 0 : index
    %c0_31 = arith.constant 0 : index
    %c0_32 = arith.constant 0 : index
    %49 = vector.load %arg11[%c0_30, %c0_31, %c0_32] : memref<4x4x32xf32, #tpu.memory_space<vmem>>, vector<4x4x32xf32>
    %50 = arith.mulf %49, %49 : vector<4x4x32xf32>
    %cst_33 = arith.constant dense<0.000000e+00> : vector<4x4xf32>
    %51 = vector.multi_reduction <add>, %50, %cst_33 [2] : vector<4x4x32xf32> to vector<4x4xf32>
    %52 = vector.shape_cast %51 : vector<4x4xf32> to vector<4x4x1xf32>
    %cst_34 = arith.constant 9.99999996E-13 : f32
    %53 = vector.broadcast %cst_34 : f32 to vector<4x4x1xf32>
    %54 = arith.addf %52, %53 : vector<4x4x1xf32>
    %55 = math.rsqrt %54 : vector<4x4x1xf32>
    %56 = vector.broadcast %55 : vector<4x4x1xf32> to vector<4x4x32xf32>
    %57 = arith.mulf %49, %56 : vector<4x4x32xf32>
    "tpu.trace_start"() <{level = 10 : i32, message = "sbd,skd->sbk"}> : () -> ()
    %cst_35 = arith.constant dense<0.000000e+00> : vector<4x4x4xf32>
    %58 = tpu.matmul %57, %57, %cst_35 {dimension_numbers = #tpu.dot_dimension_numbers<[2], [2], [1], [1], [0, 0, 0, 1, 1, 1], [0], [0]>} : vector<4x4x32xf32>, vector<4x4x32xf32>, vector<4x4x4xf32> -> vector<4x4x4xf32>
    "tpu.trace_stop"() : () -> ()
    %cst_36 = arith.constant 0.000000e+00 : f32
    %59 = vector.broadcast %cst_36 : f32 to vector<4x4x4xf32>
    %60 = arith.maximumf %58, %59 : vector<4x4x4xf32>
    %c0_37 = arith.constant 0 : index
    %c0_38 = arith.constant 0 : index
    %61 = vector.load %arg6[%c0_37, %c0_38] : memref<4x1xi32, #tpu.memory_space<vmem>>, vector<4x1xi32>
    %c0_39 = arith.constant 0 : index
    %c0_40 = arith.constant 0 : index
    %62 = vector.load %arg7[%c0_39, %c0_40] : memref<1x4xi32, #tpu.memory_space<vmem>>, vector<1x4xi32>
    %63 = vector.broadcast %61 : vector<4x1xi32> to vector<4x4xi32>
    %64 = vector.broadcast %62 : vector<1x4xi32> to vector<4x4xi32>
    %65 = arith.cmpi eq, %63, %64 : vector<4x4xi32>
    %66 = tpu.iota {dimensions = array<i32: 0>} : vector<4x4xi32>
    %67 = tpu.iota {dimensions = array<i32: 1>} : vector<4x4xi32>
    %68 = arith.cmpi ne, %66, %67 : vector<4x4xi32>
    %69 = arith.andi %65, %68 : vector<4x4xi1>
    %cst_41 = arith.constant 1.000000e+00 : f32
    %cst_42 = arith.constant 0.000000e+00 : f32
    %70 = vector.broadcast %cst_41 : f32 to vector<4x4xf32>
    %71 = vector.broadcast %cst_42 : f32 to vector<4x4xf32>
    %72 = arith.select %69, %70, %71 : vector<4x4xi1>, vector<4x4xf32>
    %73 = vector.shape_cast %72 : vector<4x4xf32> to vector<1x4x4xf32>
    %74 = vector.broadcast %73 : vector<1x4x4xf32> to vector<4x4x4xf32>
    %75 = arith.mulf %60, %74 : vector<4x4x4xf32>
    %cst_43 = arith.constant dense<0.000000e+00> : vector<4x4xf32>
    %76 = vector.multi_reduction <add>, %75, %cst_43 [2] : vector<4x4x4xf32> to vector<4x4xf32>
    %77 = vector.shape_cast %76 : vector<4x4xf32> to vector<4x4x1xf32>
    %cst_44 = arith.constant 0.000000e+00 : f32
    %78 = vector.broadcast %cst_44 : f32 to vector<4x1xf32>
    %c0_45 = arith.constant 0 : index
    %79 = memref.load %arg9[%c0_45] : memref<1xf32, #tpu.memory_space<smem>>
    %80 = vector.broadcast %79 : f32 to vector<4x1xf32>
    %81 = arith.addf %78, %80 : vector<4x1xf32>
    %82 = vector.extract_strided_slice %77 {offsets = [0, 0, 0], sizes = [1, 4, 1], strides = [1, 1, 1]} : vector<4x4x1xf32> to vector<1x4x1xf32>
    %83 = vector.shape_cast %82 : vector<1x4x1xf32> to vector<4x1xf32>
    %c0_46 = arith.constant 0 : index
    %84 = memref.load %arg8[%c0_46] : memref<4xf32, #tpu.memory_space<smem>>
    %cst_47 = arith.constant 2.500000e-01 : f32
    %85 = arith.mulf %84, %cst_47 : f32
    %86 = vector.broadcast %85 : f32 to vector<4x1xf32>
    %87 = arith.mulf %83, %86 : vector<4x1xf32>
    %88 = arith.addf %81, %87 : vector<4x1xf32>
    %89 = vector.extract_strided_slice %77 {offsets = [1, 0, 0], sizes = [1, 4, 1], strides = [1, 1, 1]} : vector<4x4x1xf32> to vector<1x4x1xf32>
    %90 = vector.shape_cast %89 : vector<1x4x1xf32> to vector<4x1xf32>
    %c1_48 = arith.constant 1 : index
    %91 = memref.load %arg8[%c1_48] : memref<4xf32, #tpu.memory_space<smem>>
    %cst_49 = arith.constant 2.500000e-01 : f32
    %92 = arith.mulf %91, %cst_49 : f32
    %93 = vector.broadcast %92 : f32 to vector<4x1xf32>
    %94 = arith.mulf %90, %93 : vector<4x1xf32>
    %95 = arith.addf %88, %94 : vector<4x1xf32>
    %96 = vector.extract_strided_slice %77 {offsets = [2, 0, 0], sizes = [1, 4, 1], strides = [1, 1, 1]} : vector<4x4x1xf32> to vector<1x4x1xf32>
    %97 = vector.shape_cast %96 : vector<1x4x1xf32> to vector<4x1xf32>
    %c2_50 = arith.constant 2 : index
    %98 = memref.load %arg8[%c2_50] : memref<4xf32, #tpu.memory_space<smem>>
    %cst_51 = arith.constant 2.500000e-01 : f32
    %99 = arith.mulf %98, %cst_51 : f32
    %100 = vector.broadcast %99 : f32 to vector<4x1xf32>
    %101 = arith.mulf %97, %100 : vector<4x1xf32>
    %102 = arith.addf %95, %101 : vector<4x1xf32>
    %103 = vector.extract_strided_slice %77 {offsets = [3, 0, 0], sizes = [1, 4, 1], strides = [1, 1, 1]} : vector<4x4x1xf32> to vector<1x4x1xf32>
    %104 = vector.shape_cast %103 : vector<1x4x1xf32> to vector<4x1xf32>
    %c3_52 = arith.constant 3 : index
    %105 = memref.load %arg8[%c3_52] : memref<4xf32, #tpu.memory_space<smem>>
    %cst_53 = arith.constant 2.500000e-01 : f32
    %106 = arith.mulf %105, %cst_53 : f32
    %107 = vector.broadcast %106 : f32 to vector<4x1xf32>
    %108 = arith.mulf %104, %107 : vector<4x1xf32>
    %109 = arith.addf %102, %108 : vector<4x1xf32>
    %c0_54 = arith.constant 0 : index
    %c0_55 = arith.constant 0 : index
    %110 = vector.load %arg10[%c0_54, %c0_55] : memref<4x1xf32, #tpu.memory_space<vmem>>, vector<4x1xf32>
    tpu.vector_store %arg10[%c0_54, %c0_55], %109 {strides = array<i32>} : memref<4x1xf32, #tpu.memory_space<vmem>>, vector<4x1xf32>,
    return
  }
}

</mosaic_0001>

<bundles_post_ra>
// kernel: tpu_custom_call.1
= control target key start
LH: loop header
LB: loop body
LE: loop exit
PB: predicated region body
PF: predicated region fallthrough
CT: control target
= control target key end

     0   :  { %16 = vsyncpa [#allocation5], 0  ;;  %s1430_s0 = inlined_call_operand.hbm [shape: f32[4,1024], index: 0, kind: input, shape index: {}]   ;;  %s1431_s1 = inlined_call_operand.hbm [shape: f32[4,512], index: 1, kind: input, shape index: {}]   ;;  %s1432_s2 = inlined_call_operand.vmem [shape: f32[4,256], index: 2, kind: input, shape index: {}]   ;;  %s1433_s3 = inlined_call_operand.vmem [shape: f32[4,128], index: 3, kind: input, shape index: {}]   ;;  %s1434_s4 = inlined_call_operand.hbm [shape: bf16[32,1920], index: 4, kind: input, shape index: {}]   ;;  %s1435_s5 = inlined_call_operand.vmem [shape: f32[4,32], index: 5, kind: input, shape index: {}]   ;;  %s1436_s6 = inlined_call_operand.vmem [shape: s32[4,1], index: 6, kind: input, shape index: {}]   ;;  %s1437_s7 = inlined_call_operand.vmem [shape: s32[1,4], index: 7, kind: input, shape index: {}]   ;;  %s1438_s8 = inlined_call_operand.vmem [shape: f32[4], index: 8, kind: input, shape index: {}]   ;;  %s1439_s9 = inlined_call_operand.<no memory space> [shape: f32[1], index: 9, kind: input, shape index: {}]   ;;  %s1440_s10 = inlined_call_operand.vmem [shape: f32[4,1], index: 10, kind: output, shape index: {}]  }
   0x1   :  { %17 = vsyncpa [#allocation8], 0 }
   0x2   :  { %18 = vsyncpa [#allocation6], 0  ;;  %s1287_s13 = smov [#allocation7]   ;;  %s1288_s15 = smov [#allocation4]  }
   0x3   :  { %s35_s14 = sshll.u32 %s1287_s13, 4  ;;  %s25_s16 = sshll.u32 %s1288_s15, 4  ;;  %s36_s14 = int_to_ptr.vmem [resolvable:$true] %s35_s14  ;;  %s26_s16 = int_to_ptr.vmem [resolvable:$true] %s25_s16 }
   0x4   :  { %s1217_s17 = scalar_lea.vmem %s36_s14, 256  ;;  %p1222_p1 = scmp.lt.s32.totalorder %s36_s14, %s36_s14 }
   0x5   :  { %p1218_p0 = scmp.ne.s32.totalorder %s36_s14, %s1217_s17  ;;  %p1223_p2 = scmp.lt.s32.totalorder %s1217_s17, %s1217_s17 }
   0x7   :  { %p1224_p3 = por %p1223_p2, %p1222_p1 }
   0x9   :  { %p1225_p4 = pnand %p1224_p3, %p1218_p0 }
   0xb   :  { %1228 = shalt.err (!%p1225_p4)
}
   0xc   :  { %38 = dma.hbm_to_vmem [thread:$0]  %s1431_s1, 256, %s36_s14, [#allocation8]  }
   0xd   :  { %s1237_s20 = scalar_lea.vmem %s26_s16, 512  ;;  %p1242_p6 = scmp.lt.s32.totalorder %s26_s16, %s26_s16 }
   0xe   :  { %p1238_p5 = scmp.ne.s32.totalorder %s26_s16, %s1237_s20  ;;  %p1243_p7 = scmp.lt.s32.totalorder %s1237_s20, %s1237_s20 }
  0x10   :  { %p1244_p8 = por %p1243_p7, %p1242_p6 }
  0x12   :  { %p1245_p9 = pnand %p1244_p8, %p1238_p5 }
  0x14   :  { %1248 = shalt.err (!%p1245_p9)
}
  0x15   :  { %28 = dma.hbm_to_vmem [thread:$0]  %s1430_s0, 512, %s26_s16, [#allocation5]  }
  0x16   :  { %s1289_s23 = smov [#allocation9]   ;;  %s67_s27 = sshll.u32 %s1438_s8, 4  ;;  %s68_s27 = int_to_ptr.vmem [resolvable:$true] %s67_s27 }
  0x17   :  { %s48_s24 = sshll.u32 %s1289_s23, 4  ;;  %s49_s24 = int_to_ptr.vmem [resolvable:$true] %s48_s24 }
  0x18   :  { %s1257_s28 = scalar_lea.vmem %s49_s24, 3840  ;;  %p1262_p11 = scmp.lt.s32.totalorder %s49_s24, %s49_s24 }
  0x19   :  { %p1258_p10 = scmp.ne.s32.totalorder %s49_s24, %s1257_s28  ;;  %p1263_p12 = scmp.lt.s32.totalorder %s1257_s28, %s1257_s28 }
  0x1b   :  { %p1264_p13 = por %p1263_p12, %p1262_p11 }
  0x1d   :  { %p1265_p0 = pnand %p1264_p13, %p1258_p10 }
  0x1f   :  { %1268 = shalt.err (!%p1265_p0)
}
  0x20   :  { %s1290_s1 = smov 960   ;;  %s1291_s29 = smov 60  }
  0x21   :  { %54 = dma.hbm_to_vmem [thread:$0]  %s1434_s4, 3840, %s49_s24, [#allocation8], %s1290_s1, %s1290_s1, %s1291_s29  }
  0x22   :  { %s1269_s0 = scalar_lea.vmem %s68_s27, 16  ;;  %p1274_p2 = scmp.lt.s32.totalorder %s68_s27, %s68_s27 }
  0x23   :  { %p1270_p1 = scmp.ne.s32.totalorder %s68_s27, %s1269_s0  ;;  %p1275_p3 = scmp.lt.s32.totalorder %s1269_s0, %s1269_s0 }
  0x25   :  { %p1276_p4 = por %p1275_p3, %p1274_p2 }
  0x27   :  { %p1277_p5 = pnand %p1276_p4, %p1270_p1 }
  0x29   :  { %1280 = shalt.err (!%p1277_p5)
}
  0x2a   :  { %s1292_s8 = smov [#allocation10]  }
  0x2b   :  { %70 = dma.vmem_to_smem %s68_s27, 16, %s1292_s8, [#allocation6]  }
  0x2c   :  { %1281 = dma.done.wait [#allocation5], 512  }
  0x2d   :  { %1282 = vsyncadd [#allocation5], 4294966784 }
  0x2e   :  { %1283 = dma.done.wait [#allocation8], 4096  }
  0x2f   :  { %1284 = vsyncadd [#allocation8], 4294963200 }
  0x30   :  { %1285 = dma.done.wait [#allocation6], 16  }
  0x31   :  { %1286 = vsyncadd [#allocation6], 4294967280 }
  0x32   :  { %85 = sfence }
  0x33   :  { %v1150_v0 = vld [vmem:[#allocation9 + $0x7c] ss:$60 sps:$4 sm:$0xff]   ;;  %v1152_v1 = vld [vmem:[#allocation9 + $0x84] ss:$60 sps:$4 sm:$0xff]   ;;  %v1158_v5 = vld [vmem:[#allocation9 + $0xc] ss:$60 sps:$4 sm:$0xff]   ;;  %v128_v61 = vlaneseq }
  0x34   :  { %224 = vmatprep.subr.bf16.mxu0 %v1150_v0  ;;  %v1154_v2 = vld [vmem:[#allocation9 + $0x78] ss:$60 sps:$4 sm:$0xff]   ;;  %v1155_v3 = vld [vmem:[#allocation9 + $0x80] ss:$60 sps:$4 sm:$0xff]   ;;  %264 = vmatprep.subr.bf16.mxu1 %v1152_v1  ;;  %v1161_v11 = vld [vmem:[#allocation9 + $0x8] ss:$60 sps:$4 sm:$0xff]  }
  0x35   :  { %v1156_v4 = vld [vmem:[#allocation9 + $0x4] ss:$60 sps:$4 sm:$0xff]   ;;  %225 = vmatpush1.bf16.xpose.msra.mxu0 %v1154_v2  ;;  %265 = vmatpush1.bf16.xpose.msra.mxu1 %v1155_v3  ;;  %v88_v6 = vld [vmem:[#allocation4] sm:$0xff]  ;;  %v89_v7 = vld [vmem:[#allocation4 + $0x8] sm:$0xff]  ;;  %v1293_v48 = vmov 0.0   ;;  %vm1294_vm0 = vmmov 0  }
  0x36   :  { %226 = vmatprep.subr.bf16.mxu0 %v1156_v4  ;;  %266 = vmatprep.subr.bf16.mxu1 %v1158_v5  ;;  %v96_v8 = vcombine.high %v88_v6, %v88_v6  ;;  %v97_v9 = vcombine.high %v89_v7, %v89_v7  ;;  %v1160_v10 = vld [vmem:[#allocation9] ss:$60 sps:$4 sm:$0xff]   ;;  %v1166_v14 = vld [vmem:[#allocation9 + $0x8c] ss:$60 sps:$4 sm:$0xff]   ;;  %v1169_v15 = vld [vmem:[#allocation9 + $0x94] ss:$60 sps:$4 sm:$0xff]   ;;  %v104_v20 = vpack.c.bf16 %v88_v6, %v88_v6 }
  0x37   :  { %v90_v16 = vld [vmem:[#allocation4 + $0x10] sm:$0xff]  ;;  %v91_v17 = vld [vmem:[#allocation4 + $0x18] sm:$0xff]  ;;  %v106_v21 = vpack.c.bf16 %v89_v7, %v89_v7  ;;  %v1172_v24 = vld [vmem:[#allocation9 + $0x14] ss:$60 sps:$4 sm:$0xff]   ;;  %v1380_v62 = vshrl.u32 %v128_v61, 7  ;;  %vm373_vm1 = vcmask 257024  }
  0x38   :  { %v105_v12 = vpack.c.bf16 %v96_v8, %v96_v8  ;;  %v107_v13 = vpack.c.bf16 %v97_v9, %v97_v9  ;;  %v98_v18 = vcombine.high %v90_v16, %v90_v16  ;;  %v99_v19 = vcombine.high %v91_v17, %v91_v17  ;;  %v1164_v22 = vld [vmem:[#allocation9 + $0x88] ss:$60 sps:$4 sm:$0xff]   ;;  %v1167_v23 = vld [vmem:[#allocation9 + $0x90] ss:$60 sps:$4 sm:$0xff]   ;;  %v1175_v25 = vld [vmem:[#allocation9 + $0x1c] ss:$60 sps:$4 sm:$0xff]  }
  0x39   :  { %v1170_v28 = vld [vmem:[#allocation9 + $0x10] ss:$60 sps:$4 sm:$0xff]   ;;  %v1173_v29 = vld [vmem:[#allocation9 + $0x18] ss:$60 sps:$4 sm:$0xff]   ;;  %v1183_v31 = vld [vmem:[#allocation9 + $0xa4] ss:$60 sps:$4 sm:$0xff]   ;;  %v108_v36 = vpack.c.bf16 %v90_v16, %v90_v16  ;;  %v110_v37 = vpack.c.bf16 %v91_v17, %v91_v17 }
  0x3a   :  { %244 = vmatprep.mubr.bf16.mxu0 %v105_v12  ;;  %284 = vmatprep.mubr.bf16.mxu1 %v107_v13  ;;  %v109_v26 = vpack.c.bf16 %v98_v18, %v98_v18  ;;  %v111_v27 = vpack.c.bf16 %v99_v19, %v99_v19  ;;  %v1180_v30 = vld [vmem:[#allocation9 + $0x9c] ss:$60 sps:$4 sm:$0xff]   ;;  %v375_v32 = vld [vmem:[#allocation7] sm:$0xff]  ;;  %v1186_v40 = vld [vmem:[#allocation9 + $0x24] ss:$60 sps:$4 sm:$0xff]   ;;  %v130_v3 = vsub.s32 0, %v1380_v62 }
  0x3b   :  { %v376_v33 = vld [vmem:[#allocation7 + $0x8] sm:$0xff]  ;;  %v379_v34 = vcombine.high %v375_v32, %v375_v32  ;;  %v1189_v41 = vld [vmem:[#allocation9 + $0x2c] ss:$60 sps:$4 sm:$0xff]   ;;  %v522_v47 = vld [vmem:[%s1432_s2] sm:$0xff]  ;;  %v383_v50 = vpack.c.bf16 %v375_v32, %v375_v32  ;;  %vm696_vm2 = vcmask 261120   ;;  %vm1014_vm6 = vcmask 27648  }
  0x3c   :  { %v380_v35 = vcombine.high %v376_v33, %v376_v33  ;;  %v1178_v38 = vld [vmem:[#allocation9 + $0x98] ss:$60 sps:$4 sm:$0xff]   ;;  %v1181_v39 = vld [vmem:[#allocation9 + $0xa0] ss:$60 sps:$4 sm:$0xff]   ;;  %v1187_v45 = vld [vmem:[#allocation9 + $0x28] ss:$60 sps:$4 sm:$0xff]   ;;  %v524_v49 = vcombine.high %v522_v47, %v522_v47  ;;  %v385_v51 = vpack.c.bf16 %v376_v33, %v376_v33  ;;  %v526_v59 = vpack.c.bf16 %v522_v47, %v522_v47 }
  0x3d   :  { %227 = vmatpush1.bf16.xpose.msra.mxu0 %v1160_v10  ;;  %267 = vmatpush1.bf16.xpose.msra.mxu1 %v1161_v11  ;;  %v384_v42 = vpack.c.bf16 %v379_v34, %v379_v34  ;;  %v1184_v44 = vld [vmem:[#allocation9 + $0x20] ss:$60 sps:$4 sm:$0xff]   ;;  %v1194_v46 = vld [vmem:[#allocation9 + $0xac] ss:$60 sps:$4 sm:$0xff]   ;;  %v1198_v54 = vld [vmem:[#allocation9 + $0x34] ss:$60 sps:$4 sm:$0xff]  }
  0x3e   :  { %304 = vmatprep.subr.bf16.mxu0 %v1166_v14  ;;  %344 = vmatprep.subr.bf16.mxu1 %v1169_v15  ;;  %v386_v43 = vpack.c.bf16 %v380_v35, %v380_v35  ;;  %v1192_v52 = vld [vmem:[#allocation9 + $0xa8] ss:$60 sps:$4 sm:$0xff]   ;;  %v1195_v53 = vld [vmem:[#allocation9 + $0xb0] ss:$60 sps:$4 sm:$0xff]   ;;  %v527_v55 = vpack.c.bf16 %v524_v49, %v524_v49  ;;  %v1199_v57 = vld [vmem:[#allocation9 + $0x38] ss:$60 sps:$4 sm:$0xff]  }
  0x3f   :  { %v1196_v56 = vld [vmem:[#allocation9 + $0x30] ss:$60 sps:$4 sm:$0xff]   ;;  %v599_v58 = vld [vmem:[%s1433_s3] sm:$0xf]  ;;  %s1098_s17 = sld [smem:[#allocation10 + $0x1]]  ;;  %vm1050_vm7 = vcmask 3072  }
  0x40   :  { %v600_v60 = vpack.c.bf16 %v599_v58, %v599_v58  ;;  %v87_v4 = vld [vmem:[%s1435_s5] sm:$0xf]  ;;  %s1099_s18 = sld [smem:[#allocation10 + $0x2]] }
  0x41   :  { %v131_v9 = vrot.slane %v87_v4, %v130_v3  ;;  %v993_v3 = vld [vmem:[%s1436_s6] sm:$0xf]  ;;  %s1100_s20 = sld [smem:[#allocation10 + $0x3]] }
  0x44   :  { %245 = vmatmul.mubr.bf16.vlgmr.msra.gmra.mxu0 %v104_v20  ;;  %285 = vmatmul.mubr.bf16.vlgmr.msra.gmra.mxu1 %v106_v21 }
  0x45   :  { %305 = vmatpush1.bf16.xpose.msra.mxu0 %v1164_v22  ;;  %345 = vmatpush1.bf16.xpose.msra.mxu1 %v1167_v23  ;;  %v397_v23 = vsub.s32 1, %v1380_v62  ;;  %s1036_s21 = smul.f32 0.25, %s1098_s17 }
  0x46   :  { %306 = vmatprep.subr.bf16.mxu0 %v1172_v24  ;;  %346 = vmatprep.subr.bf16.mxu1 %v1175_v25  ;;  %s1041_s22 = smul.f32 0.25, %s1099_s18 }
  0x47   :  { %324 = vmatprep.mubr.bf16.mxu0 %v109_v26  ;;  %364 = vmatprep.mubr.bf16.mxu1 %v111_v27  ;;  %v398_v24 = vrot.slane %v87_v4, %v397_v23  ;;  %s1046_s25 = smul.f32 0.25, %s1100_s20 }
  0x4d   :  { %307 = vmatpush1.bf16.xpose.msra.mxu0 %v1170_v28  ;;  %347 = vmatpush1.bf16.xpose.msra.mxu1 %v1173_v29 }
  0x4e   :  { %451 = vmatprep.subr.bf16.mxu0 %v1180_v30  ;;  %491 = vmatprep.subr.bf16.mxu1 %v1183_v31 }
  0x54   :  { %325 = vmatmul.mubr.bf16.vlgmr.msra.gmra.mxu0 %v108_v36  ;;  %365 = vmatmul.mubr.bf16.vlgmr.msra.gmra.mxu1 %v110_v37 }
  0x55   :  { %452 = vmatpush1.bf16.xpose.msra.mxu0 %v1178_v38  ;;  %492 = vmatpush1.bf16.xpose.msra.mxu1 %v1181_v39  ;;  %v534_v39 = vsub.s32 2, %v1380_v62 }
  0x56   :  { %453 = vmatprep.subr.bf16.mxu0 %v1186_v40  ;;  %493 = vmatprep.subr.bf16.mxu1 %v1189_v41  ;;  %v607_v40 = vsub.s32 3, %v1380_v62 }
  0x57   :  { %471 = vmatprep.mubr.bf16.mxu0 %v384_v42  ;;  %511 = vmatprep.mubr.bf16.mxu1 %v386_v43  ;;  %v535_v41 = vrot.slane %v87_v4, %v534_v39 }
  0x58   :  { %v608_v42 = vrot.slane %v87_v4, %v607_v40  ;;  %v1295_v4 = vmov 0  }
  0x59   :  { %1149 = vset.pattern.permute.xlu0 %v1295_v4 }
  0x5d   :  { %454 = vmatpush1.bf16.xpose.msra.mxu0 %v1184_v44  ;;  %494 = vmatpush1.bf16.xpose.msra.mxu1 %v1187_v45 }
  0x5e   :  { %568 = vmatprep.subr.bf16.mxu0 %v1194_v46  ;;  %1112 = vmatprep.subr.bf16.mxu1 %v1293_v48 }
  0x64   :  { %472 = vmatmul.mubr.bf16.vlgmr.msra.gmra.mxu0 %v383_v50  ;;  %512 = vmatmul.mubr.bf16.vlgmr.msra.gmra.mxu1 %v385_v51 }
  0x65   :  { %569 = vmatpush1.bf16.xpose.msra.mxu0 %v1192_v52  ;;  %1113 = vmatpush3.bf16.xpose.msra.mxu1 %v1195_v53 }
  0x66   :  { %570 = vmatprep.subr.bf16.mxu0 %v1198_v54  ;;  %1114 = vmatprep.subr.bf16.mxu1 %v1293_v48 }
  0x67   :  { %588 = vmatprep.mubr.bf16.mxu0 %v527_v55  ;;  %1116 = vmatprep.mubr.msk.bf16.mxu1 %vm1294_vm0, %v1293_v48 }
  0x6d   :  { %571 = vmatpush1.bf16.xpose.msra.mxu0 %v1196_v56  ;;  %1115 = vmatpush3.bf16.xpose.msra.mxu1 %v1199_v57 }
  0x6e   :  { %1120 = vmatprep.subr.mxu0 %v1293_v48  ;;  %1125 = vmatprep.subr.mxu1 %v1293_v48 }
  0x74   :  { %589 = vmatmul.mubr.bf16.vlgmr.msra.gmra.mxu0 %v526_v59  ;;  %1117 = vmatmul.mubr.bf16.vlgmr.msra.gmra.mxu1 %v600_v60 }
  0x75   :  { %1122 = vmatprep.mubr.msk.f32.mxu0 %vm1294_vm0, %v1293_v48  ;;  %1127 = vmatprep.mubr.msk.f32.mxu1 %vm1294_vm0, %v1293_v48 }
 0x104   :  { %v246_v63 = vpop.f32.mrf.mxu0  ;;  %v286_v0 = vpop.f32.mrf.mxu1 }
 0x105   :  { %v247_v10 = vadd.f32 %v246_v63, %v131_v9 }
 0x106   :  { %v248_v1 = vpop.f32.mrf.mxu0  ;;  %v288_v2 = vpop.f32.mrf.mxu1 }
 0x107   :  { %v287_v11 = vadd.f32 %v286_v0, %v247_v10 }
 0x108   :  { %v249_v5 = vpop.f32.mrf.mxu0  ;;  %v289_v6 = vpop.f32.mrf.mxu1 }
 0x10a   :  { %v250_v7 = vpop.f32.mrf.mxu0  ;;  %v290_v8 = vpop.f32.mrf.mxu1 }
 0x114   :  { %v326_v12 = vpop.f32.mrf.mxu0  ;;  %v366_v13 = vpop.f32.mrf.mxu1 }
 0x115   :  { %v327_v14 = vadd.f32 %v326_v12, %v287_v11 }
 0x116   :  { %v328_v15 = vpop.f32.mrf.mxu0  ;;  %v368_v16 = vpop.f32.mrf.mxu1 }
 0x117   :  { %v367_v17 = vadd.f32 %v366_v13, %v327_v14 }
 0x118   :  { %v329_v18 = vpop.f32.mrf.mxu0  ;;  %v369_v19 = vpop.f32.mrf.mxu1 }
 0x119   :  { %v372_v20 = vmax.f32 %v367_v17, 0.0 }
 0x11a   :  { %v330_v21 = vpop.f32.mrf.mxu0  ;;  %v370_v22 = vpop.f32.mrf.mxu1 }
 0x11b   :  { %374 = vst.msk [vmem:[#allocation2] sm:$0xf] %vm373_vm1, %v372_v20  ;;  %v1006_v21 = vand.u32 127, %v128_v61  ;;  %v1097_v22 = vld [vmem:[%s1437_s7] ss:$0 sm:$0xff]  ;;  %s1030_s7 = sld [smem:[#allocation10]] }
 0x11d   :  { %vm1007_vm3 = vcmp.ne.s32.totalorder %v1380_v62, %v1006_v21 }
 0x121   :  { %s1031_s19 = smul.f32 0.25, %s1030_s7 }
 0x122   :  { %v664_v25 = vld [vmem:[#allocation2] sm:$0xf] }
 0x123   :  { %v668_v26 = vmul.f32 %v664_v25, %v664_v25 }
 0x124   :  { %v473_v27 = vpop.f32.mrf.mxu0  ;;  %v513_v28 = vpop.f32.mrf.mxu1 }
 0x125   :  { %v474_v29 = vadd.f32 %v473_v27, %v398_v24  ;;  %v672_v30 = vsel %vm373_vm1, %v668_v26, 0.0 }
 0x126   :  { %v475_v31 = vpop.f32.mrf.mxu0  ;;  %v515_v32 = vpop.f32.mrf.mxu1  ;;  %673 = vadd.xlane.f32.xlu0 %v672_v30 }
 0x127   :  { %v514_v33 = vadd.f32 %v513_v28, %v474_v29 }
 0x128   :  { %v476_v34 = vpop.f32.mrf.mxu0  ;;  %v516_v35 = vpop.f32.mrf.mxu1 }
 0x129   :  { %v519_v36 = vmax.f32 %v514_v33, 0.0 }
 0x12a   :  { %v477_v37 = vpop.f32.mrf.mxu0  ;;  %v517_v38 = vpop.f32.mrf.mxu1 }
 0x12b   :  { %521 = vst.msk [vmem:[#allocation2 + $0x4] sm:$0xf] %vm373_vm1, %v519_v36 }
 0x132   :  { %v665_v43 = vld [vmem:[#allocation2 + $0x4] sm:$0xf] }
 0x133   :  { %v669_v44 = vmul.f32 %v665_v43, %v665_v43 }
 0x134   :  { %v590_v45 = vpop.f32.mrf.mxu0  ;;  %v655_v46 = vpop.f32.mrf.mxu1 }
 0x135   :  { %v591_v47 = vadd.f32 %v590_v45, %v535_v41  ;;  %v656_v49 = vadd.f32 %v655_v46, %v608_v42  ;;  %v675_v50 = vsel %vm373_vm1, %v669_v44, 0.0  ;;  %v1037_v44 = vstv %s1036_s21 }
 0x136   :  { %v592_v51 = vpop.f32.mrf.mxu0  ;;  %v1118_v52 = vpop.f32.mrf.mxu1  ;;  %676 = vadd.xlane.f32.xlu0 %v675_v50 }
 0x137   :  { %v596_v53 = vmax.f32 %v591_v47, 0.0  ;;  %v661_v54 = vmax.f32 %v656_v49, 0.0  ;;  %v1028_v47 = vstv %s1439_s9  ;;  %v1042_v49 = vstv %s1041_s22 }
 0x138   :  { %v593_v55 = vpop.f32.mrf.mxu0  ;;  %v658_v56 = vpop.f32.mrf.mxu1 }
 0x139   :  { %598 = vst.msk [vmem:[#allocation2 + $0x8] sm:$0xf] %vm373_vm1, %v596_v53  ;;  %663 = vst.msk [vmem:[#allocation2 + $0xc] sm:$0xf] %vm373_vm1, %v661_v54  ;;  %v1047_v54 = vstv %s1046_s25 }
 0x13a   :  { %v594_v57 = vpop.f32.mrf.mxu0  ;;  %v1119_v58 = vpop.f32.mrf.mxu1 }
 0x140   :  { %v666_v59 = vld [vmem:[#allocation2 + $0x8] sm:$0xf]  ;;  %v667_v60 = vld [vmem:[#allocation2 + $0xc] sm:$0xf] }
 0x141   :  { %v670_v63 = vmul.f32 %v666_v59, %v666_v59  ;;  %v671_v0 = vmul.f32 %v667_v60, %v667_v60 }
 0x143   :  { %v678_v1 = vsel %vm373_vm1, %v670_v63, 0.0  ;;  %v681_v2 = vsel %vm373_vm1, %v671_v0, 0.0 }
 0x144   :  { %679 = vadd.xlane.f32.xlu1 %v678_v1 }
 0x148   :  { %682 = vadd.xlane.f32.xlu1 %v681_v2 }
 0x14c   :  { %996 = vperm.xlu0 %1149, %v993_v3  }
 0x1af   :  { %v674_v5 = vpop.xlane.xlu0 %673 }
 0x1b0   :  { %v684_v6 = vadd.f32 1e-12, %v674_v5 }
 0x1b2   :  { %1201 = vrsqrt.f32 %v684_v6 }
 0x1bf   :  { %v1202_v7 = vpop.eup %1201  ;;  %v677_v8 = vpop.xlane.xlu0 %676 }
 0x1c0   :  { %v685_v9 = vadd.f32 1e-12, %v677_v8  ;;  %v692_v10 = vmul.f32 %v1202_v7, %v664_v25 }
 0x1c2   :  { %1203 = vrsqrt.f32 %v685_v9  ;;  %1121 = vmatpush3.xpose.msk.msra.mxu0 %vm696_vm2, %v692_v10 }
 0x1c3   :  { %1130 = vmatprep.subr.mxu0 %v1293_v48 }
 0x1c5   :  { %1123 = vmatmul.mubr.msk.f32.vlgmr.msra.gmra.mxu0 %vm696_vm2, %v692_v10 }
 0x1c6   :  { %1132 = vmatprep.mubr.msk.f32.mxu0 %vm1294_vm0, %v1293_v48 }
 0x1c7   :  { %v997_v23 = vpop.permute.xlu0 %996 }
 0x1c8   :  { %vm1002_vm4 = vcmp.eq.s32.totalorder %v997_v23, %v1097_v22 }
 0x1c9   :  { %vm1008_vm5 = vmand %vm1002_vm4, %vm1007_vm3 }
 0x1ca   :  { %v1009_v24 = vsel %vm1008_vm5, 1.0, %v1293_v48 }
 0x1cd   :  { %v680_v11 = vpop.xlane.xlu1 %679 }
 0x1ce   :  { %v686_v12 = vadd.f32 1e-12, %v680_v11 }
 0x1cf   :  { %v1204_v13 = vpop.eup %1203 }
 0x1d0   :  { %1205 = vrsqrt.f32 %v686_v12  ;;  %v693_v14 = vmul.f32 %v1204_v13, %v665_v43  ;;  %v1032_v43 = vstv %s1031_s19 }
 0x1d1   :  { %v683_v15 = vpop.xlane.xlu1 %682 }
 0x1d2   :  { %v687_v16 = vadd.f32 1e-12, %v683_v15  ;;  %1126 = vmatpush3.xpose.msk.msra.mxu1 %vm696_vm2, %v693_v14 }
 0x1d3   :  { %1135 = vmatprep.subr.mxu1 %v1293_v48 }
 0x1d4   :  { %1207 = vrsqrt.f32 %v687_v16 }
 0x1d5   :  { %1128 = vmatmul.mubr.msk.f32.vlgmr.msra.gmra.mxu1 %vm696_vm2, %v693_v14 }
 0x1d6   :  { %1137 = vmatprep.mubr.msk.f32.mxu1 %vm1294_vm0, %v1293_v48 }
 0x1dd   :  { %v1206_v17 = vpop.eup %1205 }
 0x1de   :  { %v694_v18 = vmul.f32 %v1206_v17, %v666_v59 }
 0x1e0   :  { %1131 = vmatpush3.xpose.msk.msra.mxu0 %vm696_vm2, %v694_v18 }
 0x1e1   :  { %v1208_v19 = vpop.eup %1207 }
 0x1e2   :  { %v695_v20 = vmul.f32 %v1208_v19, %v667_v60 }
 0x1e3   :  { %1133 = vmatmul.mubr.msk.f32.vlgmr.msra.gmra.mxu0 %vm696_vm2, %v694_v18 }
 0x1e4   :  { %1136 = vmatpush3.xpose.msk.msra.mxu1 %vm696_vm2, %v695_v20 }
 0x1e7   :  { %1138 = vmatmul.mubr.msk.f32.vlgmr.msra.gmra.mxu1 %vm696_vm2, %v695_v20 }
 0x285   :  { %v766_v25 = vpop.f32.mrf.mxu0 }
 0x286   :  { %v989_v26 = vmax.f32 %v766_v25, 0.0 }
 0x287   :  { %v1124_v27 = vpop.f32.mrf.mxu0 }
 0x288   :  { %v1010_v28 = vmul.f32 %v1009_v24, %v989_v26 }
 0x28a   :  { %v1015_v29 = vsel %vm1014_vm6, %v1010_v28, 0.0 }
 0x28b   :  { %1016 = vadd.xlane.f32.xlu1 %v1015_v29 }
 0x295   :  { %v839_v61 = vpop.f32.mrf.mxu1 }
 0x296   :  { %v990_v30 = vmax.f32 %v839_v61, 0.0 }
 0x297   :  { %v1129_v31 = vpop.f32.mrf.mxu1 }
 0x298   :  { %v1011_v32 = vmul.f32 %v1009_v24, %v990_v30 }
 0x29a   :  { %v1018_v33 = vsel %vm1014_vm6, %v1011_v32, 0.0 }
 0x29b   :  { %1019 = vadd.xlane.f32.xlu1 %v1018_v33 }
 0x2a3   :  { %v912_v62 = vpop.f32.mrf.mxu0 }
 0x2a4   :  { %v991_v34 = vmax.f32 %v912_v62, 0.0 }
 0x2a5   :  { %v1134_v35 = vpop.f32.mrf.mxu0 }
 0x2a6   :  { %v1012_v36 = vmul.f32 %v1009_v24, %v991_v34 }
 0x2a7   :  { %v985_v48 = vpop.f32.mrf.mxu1 }
 0x2a8   :  { %v992_v37 = vmax.f32 %v985_v48, 0.0  ;;  %v1021_v38 = vsel %vm1014_vm6, %v1012_v36, 0.0 }
 0x2a9   :  { %v1139_v39 = vpop.f32.mrf.mxu1  ;;  %1022 = vadd.xlane.f32.xlu1 %v1021_v38 }
 0x2aa   :  { %v1013_v40 = vmul.f32 %v1009_v24, %v992_v37 }
 0x2ac   :  { %v1024_v41 = vsel %vm1014_vm6, %v1013_v40, 0.0 }
 0x2ad   :  { %1025 = vadd.xlane.f32.xlu1 %v1024_v41 }
 0x314   :  { %v1017_v42 = vpop.xlane.xlu1 %1016 }
 0x315   :  { %v1033_v46 = vmul.f32 %v1032_v43, %v1017_v42 }
 0x317   :  { %v1034_v52 = vadd.f32 %v1033_v46, %v1028_v47 }
 0x324   :  { %v1020_v45 = vpop.xlane.xlu1 %1019 }
 0x325   :  { %v1038_v50 = vmul.f32 %v1037_v44, %v1020_v45 }
 0x327   :  { %v1039_v55 = vadd.f32 %v1038_v50, %v1034_v52 }
 0x332   :  { %v1023_v51 = vpop.xlane.xlu1 %1022 }
 0x333   :  { %v1043_v53 = vmul.f32 %v1042_v49, %v1023_v51 }
 0x335   :  { %v1044_v57 = vadd.f32 %v1043_v53, %v1039_v55 }
 0x336   :  { %v1026_v56 = vpop.xlane.xlu1 %1025 }
 0x337   :  { %v1048_v58 = vmul.f32 %v1047_v54, %v1026_v56 }
 0x339   :  { %v1049_v59 = vadd.f32 %v1048_v58, %v1044_v57 }
 0x33b   :  { %1051 = vst.msk [vmem:[%s1440_s10] sm:$0xf] %vm1050_vm7, %v1049_v59 }
 0x33c   :  { %1056 = vsyncpa [#allocation5], 1 }
 0x33d   :  { %1057 = vsyncpa [#allocation8], 1 }
 0x33e   :  { %1058 = vsyncpa [#allocation6], 1 }

</bundles_post_ra>
